<compile_context>
chip_gen: v7x
topology: tpu7x:2x2x1
jax: 0.10.0
libtpu: 0.0.40
codegen_flags: <defaults>
</compile_context>

<pallas_src>
import jax
import jax.numpy as jnp
import numpy as np
from jax.experimental import pallas as pl
from jax.experimental.pallas import tpu as pltpu


def conv2x2_kernel(lhs_ref, rhs_ref, bias_ref, o_ref):
    # lhs_ref : (M_pad, K_pad)  im2col rows (one row per output image row, whole batch)
    # rhs_ref : (K_pad, L_pad)  block-Toeplitz weight (2x2 taps + 4-way pad/crop sum folded)
    # bias_ref: (1, L_pad)      4*bias tiled across the W lane groups
    # o_ref   : (M_pad, L_pad)  lane-dense output rows (unmasked full-lane stores)
    acc = jnp.dot(lhs_ref[...], rhs_ref[...], preferred_element_type=jnp.float32)
    o_ref[...] = (acc + bias_ref[...]).astype(o_ref.dtype)


def _round_up(x, m):
    return ((x + m - 1) // m) * m


def _build_rhs(weight_oihw, W, k_pad, l_pad):
    """Block-Toeplitz RHS folding the 2x2 taps and the 4-way pad/crop sum.

    B[a*(W+2)*C1 + q*C1 + c1, w*C2 + c2] = weff[a, q - w, c1, c2] for
    0 <= q - w <= 2 and 0 otherwise, where weff is the 2x2 weight box-summed
    to 3x3 (the effective SAME-conv kernel of the four padded convs).
    """
    C2, C1 = weight_oihw.shape[0], weight_oihw.shape[1]
    w_hwio = jnp.transpose(weight_oihw, (2, 3, 1, 0))            # (2, 2, C1, C2)

    weff = jnp.zeros((3, 3, C1, C2), w_hwio.dtype)
    for dh in range(2):                                          # trace-time loop (tiny)
        for dw in range(2):
            weff = weff.at[dh:dh + 2, dw:dw + 2, :, :].add(w_hwio)

    Wp = W + 2
    q = jnp.arange(Wp)[:, None]                                  # (Wp, 1)
    w = jnp.arange(W)[None, :]                                   # (1, W)
    off = q - w                                                  # (Wp, W)
    valid = ((off >= 0) & (off <= 2)).astype(w_hwio.dtype)
    idx = jnp.clip(off, 0, 2)

    wg = weff[:, idx, :, :]                                      # (3, Wp, W, C1, C2)
    wg = wg * valid[None, :, :, None, None]
    wg = jnp.transpose(wg, (0, 1, 3, 2, 4))                      # (3, Wp, C1, W, C2)
    rhs = wg.reshape(3 * Wp * C1, W * C2)
    return jnp.pad(rhs, ((0, k_pad - rhs.shape[0]), (0, l_pad - rhs.shape[1])))


def conv2x2_initial_release_forward(x_nchw, weight_oihw, bias):
    """x_nchw: (N, C1, H, W); weight_oihw: (C2, C1, 2, 2); bias: (C2,)."""
    N, C1, H, W = x_nchw.shape
    C2 = weight_oihw.shape[0]

    M = N * H                      # batch folded into the matmul M dimension
    K = 3 * (W + 2) * C1           # im2col contraction (no lane padding inside)
    L = W * C2                     # lane-dense output width
    m_pad = _round_up(M, 8)
    k_pad = _round_up(K, 128)
    l_pad = _round_up(L, 128)

    # Wrapper glue (tiny at these shapes): NCHW->NHWC, one 1-px zero halo
    # (realizes all four asymmetric pads at once), then a 3-row im2col so the
    # kernel LHS is a plain contiguous (N*H, K) slab -- no sublane-offset
    # slicing or concatenation inside the kernel.
    x_nhwc = jnp.transpose(x_nchw, (0, 2, 3, 1))
    x_p = jnp.pad(x_nhwc, ((0, 0), (1, 1), (1, 1), (0, 0)))      # (N, H+2, W+2, C1)
    rows = jnp.stack([x_p[:, 0:H], x_p[:, 1:H + 1], x_p[:, 2:H + 2]], axis=2)
    lhs = rows.reshape(M, K)                                     # (N*H, 3*(W+2)*C1)
    lhs = jnp.pad(lhs, ((0, m_pad - M), (0, k_pad - K)))

    rhs = _build_rhs(weight_oihw, W, k_pad, l_pad)               # (k_pad, l_pad)
    bias_row = jnp.pad(jnp.tile(4.0 * bias, W), (0, l_pad - L)).reshape(1, l_pad)

    # Single grid step on one core: the whole batch is one
    # (m_pad, k_pad) @ (k_pad, l_pad) MXU contraction. Total VMEM ~0.2 MiB,
    # far below every chip's limit (incl. v7x's 64 MiB).
    # TODO(synk): for large N*H, tile M in >=128-row blocks via grid=(m_pad//bm,)
    # and (if tolerances allow) cast LHS/RHS to bf16 for v6e/v7x MXU throughput.
    out_flat = pl.pallas_call(
        conv2x2_kernel,
        out_shape=jax.ShapeDtypeStruct((m_pad, l_pad), x_nchw.dtype),
        grid=(1,),
        in_specs=[
            pl.BlockSpec((m_pad, k_pad), lambda i: (0, 0)),
            pl.BlockSpec((k_pad, l_pad), lambda i: (0, 0)),
            pl.BlockSpec((1, l_pad), lambda i: (0, 0)),
        ],
        out_specs=pl.BlockSpec((m_pad, l_pad), lambda i: (0, 0)),
        compiler_params=pltpu.CompilerParams(
            dimension_semantics=("arbitrary",)),
    )(lhs, rhs, bias_row)

    out_nhwc = out_flat[:M, :L].reshape(N, H, W, C2)
    return jnp.transpose(out_nhwc, (0, 3, 1, 2))                  # back to NCHW


def torch_reference(x, weight, bias):
    """Pure-JAX replica of the PyTorch forward (four pads + 2x2 conv)."""
    def conv(inp):
        y = jax.lax.conv_general_dilated(
            inp, weight, window_strides=(1, 1), padding="VALID",
            dimension_numbers=("NCHW", "OIHW", "NCHW"))
        return y + bias[None, :, None, None]
    x1 = jnp.pad(x, ((0, 0), (0, 0), (1, 0), (1, 0)))  # pad (1,0,1,0)
    x2 = jnp.pad(x, ((0, 0), (0, 0), (1, 0), (0, 1)))  # pad (0,1,1,0)
    x3 = jnp.pad(x, ((0, 0), (0, 0), (0, 1), (1, 0)))  # pad (1,0,0,1)
    x4 = jnp.pad(x, ((0, 0), (0, 0), (0, 1), (0, 1)))  # pad (0,1,0,1)
    return conv(x1) + conv(x2) + conv(x3) + conv(x4)


if __name__ == "__main__":
    key = jax.random.PRNGKey(0)
    kx, kw, kb = jax.random.split(key, 3)

    N, C1, C2, H, W = 2, 4, 8, 16, 16
    x = jax.random.normal(kx, (N, C1, H, W), jnp.float32)

    # deterministic init matching nn.Conv2d default U(-k, k), k = 1/sqrt(C1*2*2)
    bound = 1.0 / float(np.sqrt(C1 * 2 * 2))
    weight = jax.random.uniform(kw, (C2, C1, 2, 2), jnp.float32, -bound, bound)
    bias = jax.random.uniform(kb, (C2,), jnp.float32, -bound, bound)

    out = conv2x2_initial_release_forward(x, weight, bias)
    out = jax.block_until_ready(out)

    ref = torch_reference(x, weight, bias)
    np.testing.assert_allclose(np.asarray(out), np.asarray(ref),
                               rtol=1e-4, atol=1e-4)
    print("KERNEL_OK")
</pallas_src>

<mosaic_0001>
module attributes {stable_mosaic.version = 11 : i64} {
  func.func @conv2x2_kernel(%arg0: i32, %arg1: memref<32x256xf32, #tpu.memory_space<vmem>>, %arg2: memref<256x128xf32, #tpu.memory_space<vmem>>, %arg3: memref<1x128xf32, #tpu.memory_space<vmem>>, %arg4: memref<32x128xf32, #tpu.memory_space<vmem>>) attributes {dimension_semantics = [#tpu.dimension_semantics<arbitrary>], iteration_bounds = array<i64: 1>, scalar_prefetch = 0 : i64, scratch_operands = 0 : i64, tpu.core_type = #tpu.core_type<tc>, window_params = [{pipeline_mode = #tpu.pipeline_mode<synchronous>, transform_indices = @transform_0, window_bounds = array<i64: 32, 256>}, {pipeline_mode = #tpu.pipeline_mode<synchronous>, transform_indices = @transform_1, window_bounds = array<i64: 256, 128>}, {pipeline_mode = #tpu.pipeline_mode<synchronous>, transform_indices = @transform_2, window_bounds = array<i64: 1, 128>}, {pipeline_mode = #tpu.pipeline_mode<synchronous>, transform_indices = @transform_3, window_bounds = array<i64: 32, 128>}]} {
    %c0 = arith.constant 0 : index
    %c0_0 = arith.constant 0 : index
    %0 = vector.load %arg1[%c0, %c0_0] : memref<32x256xf32, #tpu.memory_space<vmem>>, vector<32x256xf32>
    %c0_1 = arith.constant 0 : index
    %c0_2 = arith.constant 0 : index
    %1 = vector.load %arg2[%c0_1, %c0_2] : memref<256x128xf32, #tpu.memory_space<vmem>>, vector<256x128xf32>
    %cst = arith.constant dense<0.000000e+00> : vector<32x128xf32>
    %2 = tpu.matmul %0, %1, %cst {dimension_numbers = #tpu.dot_dimension_numbers<[1], [0], [0], [1], [0, 0, 1, 1], [], []>} : vector<32x256xf32>, vector<256x128xf32>, vector<32x128xf32> -> vector<32x128xf32>
    %c0_3 = arith.constant 0 : index
    %c0_4 = arith.constant 0 : index
    %3 = vector.load %arg3[%c0_3, %c0_4] : memref<1x128xf32, #tpu.memory_space<vmem>>, vector<1x128xf32>
    %4 = vector.broadcast %3 : vector<1x128xf32> to vector<32x128xf32>
    %5 = arith.addf %2, %4 : vector<32x128xf32>
    %c0_5 = arith.constant 0 : index
    %c0_6 = arith.constant 0 : index
    %6 = vector.load %arg4[%c0_5, %c0_6] : memref<32x128xf32, #tpu.memory_space<vmem>>, vector<32x128xf32>
    tpu.vector_store %arg4[%c0_5, %c0_6], %5 {strides = array<i32>} : memref<32x128xf32, #tpu.memory_space<vmem>>, vector<32x128xf32>,
    return
  }
  func.func @transform_0(%arg0: i32) -> (i32, i32) {
    %c0_i32 = arith.constant 0 : i32
    %c0_i32_0 = arith.constant 0 : i32
    %c0_i32_1 = arith.constant 0 : i32
    return %c0_i32, %c0_i32_0 : i32, i32
  }
  func.func @transform_1(%arg0: i32) -> (i32, i32) {
    %c0_i32 = arith.constant 0 : i32
    %c0_i32_0 = arith.constant 0 : i32
    %c0_i32_1 = arith.constant 0 : i32
    return %c0_i32, %c0_i32_0 : i32, i32
  }
  func.func @transform_2(%arg0: i32) -> (i32, i32) {
    %c0_i32 = arith.constant 0 : i32
    %c0_i32_0 = arith.constant 0 : i32
    %c0_i32_1 = arith.constant 0 : i32
    return %c0_i32, %c0_i32_0 : i32, i32
  }
  func.func @transform_3(%arg0: i32) -> (i32, i32) {
    %c0_i32 = arith.constant 0 : i32
    %c0_i32_0 = arith.constant 0 : i32
    %c0_i32_1 = arith.constant 0 : i32
    return %c0_i32, %c0_i32_0 : i32, i32
  }
}

</mosaic_0001>

<bundles_post_ra>
// kernel: tpu_custom_call.1
= control target key start
LH: loop header
LB: loop body
LE: loop exit
PB: predicated region body
PF: predicated region fallthrough
CT: control target
= control target key end

     0   :  { %8 = vsyncpa [#allocation3], 0  ;;  %s441_s0 = inlined_call_operand.hbm [shape: f32[32,256], index: 0, kind: input, shape index: {}]   ;;  %s442_s1 = inlined_call_operand.hbm [shape: f32[256,128], index: 1, kind: input, shape index: {}]   ;;  %s443_s2 = inlined_call_operand.vmem [shape: f32[1,128], index: 2, kind: input, shape index: {}]   ;;  %s444_s3 = inlined_call_operand.hbm [shape: f32[32,128], index: 3, kind: output, shape index: {}]  }
   0x1   :  { %9 = vsyncpa [#allocation6], 0 }
   0x2   :  { %10 = vsyncpa [#allocation4], 0  ;;  %s369_s12 = smov [#allocation2]   ;;  %s297_s16 = scalar_lea.hbm %s441_s0, 1024 }
   0x3   :  { %s16_s13 = sshll.u32 %s369_s12, 4  ;;  %p298_p0 = scmp.ne.s32.totalorder %s441_s0, %s297_s16  ;;  %s17_s13 = int_to_ptr.vmem [resolvable:$true] %s16_s13 }
   0x4   :  { %p301_p1 = scmp.lt.u32.totalorder %s297_s16, %s441_s0 }
   0x6   :  { %p303_p2 = pnand %p301_p1, %p298_p0 }
   0x8   :  { %306 = shalt.err (!%p303_p2)
}
   0x9   :  { %s307_s21 = scalar_lea.vmem %s17_s13, 1024  ;;  %p312_p4 = scmp.lt.s32.totalorder %s17_s13, %s17_s13 }
   0xa   :  { %p308_p3 = scmp.ne.s32.totalorder %s17_s13, %s307_s21  ;;  %p313_p5 = scmp.lt.s32.totalorder %s307_s21, %s307_s21 }
   0xc   :  { %p314_p6 = por %p313_p5, %p312_p4 }
   0xe   :  { %p315_p7 = pnand %p314_p6, %p308_p3 }
  0x10   :  { %318 = shalt.err (!%p315_p7)
}
  0x11   :  { %s370_s22 = smov 256   ;;  %s371_s23 = smov 16  }
  0x12   :  { %22 = dma.hbm_to_vmem [thread:$0]  %s441_s0, 1024, %s17_s13, [#allocation3], %s370_s22, %s370_s22, %s371_s23  }
  0x13   :  { %s372_s26 = smov [#allocation5]   ;;  %s319_s30 = scalar_lea.hbm %s442_s1, 4096 }
  0x14   :  { %s28_s27 = sshll.u32 %s372_s26, 4  ;;  %p320_p8 = scmp.ne.s32.totalorder %s442_s1, %s319_s30  ;;  %s29_s27 = int_to_ptr.vmem [resolvable:$true] %s28_s27 }
  0x15   :  { %p323_p9 = scmp.lt.u32.totalorder %s319_s30, %s442_s1 }
  0x17   :  { %p325_p10 = pnand %p323_p9, %p320_p8 }
  0x19   :  { %328 = shalt.err (!%p325_p10)
}
  0x1a   :  { %s329_s8 = scalar_lea.vmem %s29_s27, 4096  ;;  %p334_p12 = scmp.lt.s32.totalorder %s29_s27, %s29_s27 }
  0x1b   :  { %p330_p11 = scmp.ne.s32.totalorder %s29_s27, %s329_s8  ;;  %p335_p13 = scmp.lt.s32.totalorder %s329_s8, %s329_s8 }
  0x1d   :  { %p336_p0 = por %p335_p13, %p334_p12 }
  0x1f   :  { %p337_p1 = pnand %p336_p0, %p330_p11 }
  0x21   :  { %340 = shalt.err (!%p337_p1)
}
  0x22   :  { %s373_s0 = smov 128   ;;  %s374_s9 = smov 8  }
  0x23   :  { %34 = dma.hbm_to_vmem [thread:$0]  %s442_s1, 4096, %s29_s27, [#allocation6], %s373_s0, %s373_s0, %s374_s9  }
  0x24   :  { %363 = dma.done.wait [#allocation3], 1024  }
  0x25   :  { %364 = vsyncadd [#allocation3], 4294966272 }
  0x26   :  { %365 = dma.done.wait [#allocation6], 4096  }
  0x27   :  { %366 = vsyncadd [#allocation6], 4294963200  ;;  %v67_v0 = vld [vmem:[#allocation5 + $0x80] sm:$0xff]  ;;  %v68_v1 = vld [vmem:[#allocation5 + $0x88] sm:$0xff]  ;;  %s375_s13 = smov [#allocation7]  }
  0x28   :  { %v51_v2 = vld [vmem:[#allocation5] sm:$0xff]  ;;  %v242_v3 = vpack.c.bf16 %v68_v1, %v67_v0  ;;  %v52_v4 = vld [vmem:[#allocation5 + $0x8] sm:$0xff]  ;;  %v69_v5 = vld [vmem:[#allocation5 + $0x90] sm:$0xff]  ;;  %s184_s14 = sshll.u32 %s375_s13, 4  ;;  %s185_s14 = int_to_ptr.vmem [resolvable:$true] %s184_s14 }
  0x29   :  { %v70_v6 = vld [vmem:[#allocation5 + $0x98] sm:$0xff]  ;;  %v244_v7 = vpack.c.bf16 %v52_v4, %v51_v2  ;;  %v53_v9 = vld [vmem:[#allocation5 + $0x10] sm:$0xff]  ;;  %v71_v11 = vld [vmem:[#allocation5 + $0xa0] sm:$0xff]  ;;  %p346_p3 = scmp.lt.s32.totalorder %s185_s14, %s185_s14 }
  0x2a   :  { %v246_v8 = vpack.c.bf16 %v70_v6, %v69_v5  ;;  %v54_v10 = vld [vmem:[#allocation5 + $0x18] sm:$0xff]  ;;  %243 = vmatprep.subr.bf16.mxu0 %v242_v3  ;;  %274 = vmatprep.subr.bf16.mxu1 %v242_v3  ;;  %v72_v12 = vld [vmem:[#allocation5 + $0xa8] sm:$0xff]  ;;  %v55_v15 = vld [vmem:[#allocation5 + $0x20] sm:$0xff] }
  0x2b   :  { %245 = vmatpush3.bf16.msra.mxu0 %v244_v7  ;;  %282 = vmatpush3.bf16.msra.mxu1 %v244_v7  ;;  %v248_v13 = vpack.c.bf16 %v54_v10, %v53_v9  ;;  %v250_v14 = vpack.c.bf16 %v72_v12, %v71_v11  ;;  %v56_v16 = vld [vmem:[#allocation5 + $0x28] sm:$0xff]  ;;  %v73_v17 = vld [vmem:[#allocation5 + $0xb0] sm:$0xff]  ;;  %v74_v18 = vld [vmem:[#allocation5 + $0xb8] sm:$0xff] }
  0x2c   :  { %247 = vmatprep.subr.bf16.mxu0 %v246_v8  ;;  %275 = vmatprep.subr.bf16.mxu1 %v246_v8  ;;  %v252_v19 = vpack.c.bf16 %v56_v16, %v55_v15  ;;  %v254_v20 = vpack.c.bf16 %v74_v18, %v73_v17  ;;  %v57_v21 = vld [vmem:[#allocation5 + $0x30] sm:$0xff]  ;;  %v58_v22 = vld [vmem:[#allocation5 + $0x38] sm:$0xff]  ;;  %v75_v23 = vld [vmem:[#allocation5 + $0xc0] sm:$0xff] }
  0x2d   :  { %v76_v24 = vld [vmem:[#allocation5 + $0xc8] sm:$0xff]  ;;  %v256_v27 = vpack.c.bf16 %v58_v22, %v57_v21  ;;  %v59_v29 = vld [vmem:[#allocation5 + $0x40] sm:$0xff]  ;;  %v77_v31 = vld [vmem:[#allocation5 + $0xd0] sm:$0xff] }
  0x2e   :  { %v44_v25 = vld [vmem:[#allocation2 + $0x8] sm:$0xff]  ;;  %v258_v28 = vpack.c.bf16 %v76_v24, %v75_v23  ;;  %v78_v32 = vld [vmem:[#allocation5 + $0xd8] sm:$0xff]  ;;  %v61_v35 = vld [vmem:[#allocation5 + $0x50] sm:$0xff] }
  0x2f   :  { %249 = vmatpush3.bf16.msra.mxu0 %v248_v13  ;;  %283 = vmatpush3.bf16.msra.mxu1 %v248_v13  ;;  %v48_v26 = vld [vmem:[#allocation2 + $0x28] sm:$0xff]  ;;  %v262_v34 = vpack.c.bf16 %v78_v32, %v77_v31  ;;  %v62_v36 = vld [vmem:[#allocation5 + $0x58] sm:$0xff]  ;;  %v79_v37 = vld [vmem:[#allocation5 + $0xe0] sm:$0xff] }
  0x30   :  { %251 = vmatprep.subr.bf16.mxu0 %v250_v14  ;;  %276 = vmatprep.subr.bf16.mxu1 %v250_v14  ;;  %v60_v30 = vld [vmem:[#allocation5 + $0x48] sm:$0xff]  ;;  %v264_v39 = vpack.c.bf16 %v62_v36, %v61_v35  ;;  %v63_v41 = vld [vmem:[#allocation5 + $0x60] sm:$0xff]  ;;  %v81_v43 = vld [vmem:[#allocation5 + $0xf0] sm:$0xff] }
  0x31   :  { %154 = vmatprep.mubr.f32.mxu0 %v44_v25  ;;  %164 = vmatprep.mubr.f32.mxu1 %v48_v26  ;;  %v260_v33 = vpack.c.bf16 %v60_v30, %v59_v29  ;;  %v80_v38 = vld [vmem:[#allocation5 + $0xe8] sm:$0xff]  ;;  %v82_v44 = vld [vmem:[#allocation5 + $0xf8] sm:$0xff]  ;;  %v65_v47 = vld [vmem:[#allocation5 + $0x70] sm:$0xff] }
  0x32   :  { %v266_v40 = vpack.c.bf16 %v80_v38, %v79_v37  ;;  %v64_v42 = vld [vmem:[#allocation5 + $0x68] sm:$0xff]  ;;  %v270_v46 = vpack.c.bf16 %v82_v44, %v81_v43  ;;  %v66_v48 = vld [vmem:[#allocation5 + $0x78] sm:$0xff]  ;;  %v43_v50 = vld [vmem:[#allocation2] sm:$0xff] }
  0x33   :  { %253 = vmatpush3.bf16.msra.mxu0 %v252_v19  ;;  %284 = vmatpush3.bf16.msra.mxu1 %v252_v19  ;;  %v268_v45 = vpack.c.bf16 %v64_v42, %v63_v41  ;;  %v272_v49 = vpack.c.bf16 %v66_v48, %v65_v47  ;;  %v47_v51 = vld [vmem:[#allocation2 + $0x20] sm:$0xff]  ;;  %v46_v52 = vld [vmem:[#allocation2 + $0x18] sm:$0xff]  ;;  %v45_v54 = vld [vmem:[#allocation2 + $0x10] sm:$0xff] }
  0x34   :  { %255 = vmatprep.subr.bf16.mxu0 %v254_v20  ;;  %277 = vmatprep.subr.bf16.mxu1 %v254_v20  ;;  %v50_v53 = vld [vmem:[#allocation2 + $0x38] sm:$0xff]  ;;  %v49_v55 = vld [vmem:[#allocation2 + $0x30] sm:$0xff]  ;;  %v197_v58 = vld [vmem:[%s443_s2] ss:$0 sm:$0xff]  ;;  %s341_s2 = scalar_lea.vmem %s185_s14, 512 }
  0x35   :  { %p342_p2 = scmp.ne.s32.totalorder %s185_s14, %s341_s2  ;;  %p347_p4 = scmp.lt.s32.totalorder %s341_s2, %s341_s2 }
  0x37   :  { %257 = vmatpush3.bf16.msra.mxu0 %v256_v27  ;;  %285 = vmatpush3.bf16.msra.mxu1 %v256_v27  ;;  %p348_p5 = por %p347_p4, %p346_p3 }
  0x38   :  { %259 = vmatprep.subr.bf16.mxu0 %v258_v28  ;;  %278 = vmatprep.subr.bf16.mxu1 %v258_v28 }
  0x39   :  { %p349_p6 = pnand %p348_p5, %p342_p2 }
  0x3b   :  { %261 = vmatpush3.bf16.msra.mxu0 %v260_v33  ;;  %286 = vmatpush3.bf16.msra.mxu1 %v260_v33 }
  0x3c   :  { %263 = vmatprep.subr.bf16.mxu0 %v262_v34  ;;  %279 = vmatprep.subr.bf16.mxu1 %v262_v34 }
  0x3f   :  { %265 = vmatpush3.bf16.msra.mxu0 %v264_v39  ;;  %287 = vmatpush3.bf16.msra.mxu1 %v264_v39 }
  0x40   :  { %267 = vmatprep.subr.bf16.mxu0 %v266_v40  ;;  %280 = vmatprep.subr.bf16.mxu1 %v266_v40 }
  0x43   :  { %269 = vmatpush3.bf16.msra.mxu0 %v268_v45  ;;  %288 = vmatpush3.bf16.msra.mxu1 %v268_v45 }
  0x44   :  { %271 = vmatprep.subr.bf16.mxu0 %v270_v46  ;;  %281 = vmatprep.subr.bf16.mxu1 %v270_v46 }
  0x47   :  { %273 = vmatpush3.bf16.msra.mxu0 %v272_v49  ;;  %289 = vmatpush3.bf16.msra.mxu1 %v272_v49 }
  0x4a   :  { %155 = vmatmul.mubr.f32.vlgmr.msra.gmra.mrb[0].mxu0 %v43_v50  ;;  %165 = vmatmul.mubr.f32.vlgmr.msra.gmra.mrb[0].mxu1 %v47_v51 }
  0x4b   :  { %159 = vmatprep.mubr.f32.mxu0 %v46_v52  ;;  %169 = vmatprep.mubr.f32.mxu1 %v50_v53 }
  0x4e   :  { %160 = vmatmul.mubr.f32.gmra.mrb[2].mxu0 %v45_v54  ;;  %170 = vmatmul.mubr.f32.gmra.mrb[2].mxu1 %v49_v55 }
 0x11d   :  { %v230_v56 = vpop.f32.mrb[0].mxu0  ;;  %v236_v57 = vpop.f32.mrb[0].mxu1 }
 0x11e   :  { %v231_v59 = vpop.f32.mrb[1].mxu0  ;;  %v237_v60 = vpop.f32.mrb[1].mxu1 }
 0x11f   :  { %v232_v61 = vadd.f32 %v231_v59, %v230_v56  ;;  %v238_v62 = vadd.f32 %v237_v60, %v236_v57 }
 0x121   :  { %v157_v63 = vadd.f32 %v232_v61, %v197_v58  ;;  %v167_v0 = vadd.f32 %v238_v62, %v197_v58  ;;  %v233_v1 = vpop.f32.mrb[2].mxu0  ;;  %v239_v2 = vpop.f32.mrb[2].mxu1 }
 0x122   :  { %v234_v3 = vpop.f32.mrb[3].mxu0  ;;  %v240_v4 = vpop.f32.mrb[3].mxu1 }
 0x123   :  { %175 = vst [vmem:[#allocation7] sm:$0xff] %v157_v63  ;;  %177 = vst [vmem:[#allocation7 + $0x10] sm:$0xff] %v167_v0  ;;  %v235_v5 = vadd.f32 %v234_v3, %v233_v1  ;;  %v241_v6 = vadd.f32 %v240_v4, %v239_v2 }
 0x125   :  { %v162_v7 = vadd.f32 %v235_v5, %v197_v58  ;;  %v172_v8 = vadd.f32 %v241_v6, %v197_v58 }
 0x127   :  { %176 = vst [vmem:[#allocation7 + $0x8] sm:$0xff] %v162_v7  ;;  %178 = vst [vmem:[#allocation7 + $0x18] sm:$0xff] %v172_v8 }
 0x128   :  { %352 = shalt.err (!%p349_p6)
}
 0x129   :  { %s353_s17 = scalar_lea.hbm %s444_s3, 512 }
 0x12a   :  { %p354_p7 = scmp.ne.s32.totalorder %s444_s3, %s353_s17  ;;  %p357_p8 = scmp.lt.u32.totalorder %s353_s17, %s444_s3 }
 0x12c   :  { %p359_p9 = pnand %p357_p8, %p354_p7 }
 0x12e   :  { %362 = shalt.err (!%p359_p9)
}
 0x12f   :  { %190 = dma.vmem_to_hbm [thread:$0]  %s185_s14, 512, %s444_s3, [#allocation4], %s373_s0, %s373_s0, %s374_s9  }
 0x130   :  { %367 = dma.done.wait [#allocation4], 512  }
 0x131   :  { %368 = vsyncadd [#allocation4], 4294966784 }
 0x132   :  { %194 = vsyncpa [#allocation3], 1 }
 0x133   :  { %195 = vsyncpa [#allocation6], 1 }
 0x134   :  { %196 = vsyncpa [#allocation4], 1 }

</bundles_post_ra>
